<compile_context>
chip_gen: v7x
topology: tpu7x:2x2x1
jax: 0.10.0
libtpu: 0.0.40
codegen_flags: <defaults>
</compile_context>

<pallas_src>
import functools

import jax
import jax.numpy as jnp
from jax.experimental import pallas as pl
from jax.experimental.pallas import tpu as pltpu


def _mlp_kernel(x_ref, w1_ref, b1_ref, w2_ref, b2_ref, o_ref):
    # Layer 1: Linear (bf16 MXU inputs, f32 accumulation) + bias + ReLU in f32.
    h = jnp.dot(x_ref[...], w1_ref[...], preferred_element_type=jnp.float32)
    h = jnp.maximum(h + b1_ref[...], 0.0)          # b1 is [1, hidden]
    # Layer 2: cast the activation back to the matmul dtype for MXU throughput.
    y = jnp.dot(h.astype(w2_ref.dtype), w2_ref[...],
                preferred_element_type=jnp.float32)
    y = jnp.maximum(y + b2_ref[...], 0.0)          # b2 is [1, out]
    o_ref[...] = y.astype(o_ref.dtype)


@functools.partial(jax.jit, static_argnames=("tile_b", "compute_dtype"))
def actor_critic_forward(x, w1, b1, w2, b2, *, tile_b=128,
                         compute_dtype=jnp.bfloat16):
    """x: [B, H, W] (or [B, H*W]); returns [B, out_features] in x's dtype."""
    in_features, hidden = w1.shape
    out_features = w2.shape[1]

    x2d = x.reshape(-1, in_features)               # the .view(-1, H*W) glue
    batch = x2d.shape[0]
    out_dtype = x2d.dtype

    # Pad the batch up to a multiple of the tile so every grid step feeds the
    # MXU a full row block (padded rows are sliced off at the end).
    num_tiles = pl.cdiv(batch, tile_b)
    padded_b = num_tiles * tile_b
    if padded_b != batch:
        x2d = jnp.pad(x2d, ((0, padded_b - batch), (0, 0)))

    # bf16 matmul operands, f32 epilogue (biases stay f32).
    x2d = x2d.astype(compute_dtype)
    w1c = w1.astype(compute_dtype)
    w2c = w2.astype(compute_dtype)
    b1_2d = b1.reshape(1, hidden).astype(jnp.float32)
    b2_2d = b2.reshape(1, out_features).astype(jnp.float32)

    itemsize = jnp.dtype(compute_dtype).itemsize
    cost = pl.CostEstimate(
        flops=2 * padded_b * (in_features * hidden + hidden * out_features),
        bytes_accessed=(padded_b * in_features * itemsize
                        + in_features * hidden * itemsize
                        + hidden * out_features * itemsize
                        + (hidden + out_features) * 4
                        + padded_b * out_features * jnp.dtype(out_dtype).itemsize),
        transcendentals=0,
    )

    out = pl.pallas_call(
        _mlp_kernel,
        out_shape=jax.ShapeDtypeStruct((padded_b, out_features), out_dtype),
        grid_spec=pltpu.PrefetchScalarGridSpec(
            num_scalar_prefetch=0,
            grid=(num_tiles,),
            in_specs=[
                # Batch-tiled activation: new block each grid step (pipelined).
                pl.BlockSpec((tile_b, in_features), lambda i: (i, 0)),
                # Weights / biases: constant block index -> stay VMEM-resident.
                pl.BlockSpec((in_features, hidden), lambda i: (0, 0)),
                pl.BlockSpec((1, hidden), lambda i: (0, 0)),
                pl.BlockSpec((hidden, out_features), lambda i: (0, 0)),
                pl.BlockSpec((1, out_features), lambda i: (0, 0)),
            ],
            out_specs=pl.BlockSpec((tile_b, out_features), lambda i: (i, 0)),
        ),
        compiler_params=pltpu.CompilerParams(
            # Batch tiles are independent -> megacore sharding on v7x.
            dimension_semantics=("parallel",)),
        cost_estimate=cost,
    )(x2d, w1c, b1_2d, w2c, b2_2d)

    return out[:batch]


def init_params(key, in_features, hidden, out_features):
    """Deterministic init mimicking nn.Linear default (uniform +/- 1/sqrt(fan_in))."""
    k1, k2, k3, k4 = jax.random.split(key, 4)
    lim1 = 1.0 / jnp.sqrt(in_features)
    lim2 = 1.0 / jnp.sqrt(hidden)
    w1 = jax.random.uniform(k1, (in_features, hidden), jnp.float32, -lim1, lim1)
    b1 = jax.random.uniform(k2, (hidden,), jnp.float32, -lim1, lim1)
    w2 = jax.random.uniform(k3, (hidden, out_features), jnp.float32, -lim2, lim2)
    b2 = jax.random.uniform(k4, (out_features,), jnp.float32, -lim2, lim2)
    return w1, b1, w2, b2


if __name__ == "__main__":
    # Shapes consistent with the module: input_shape=(8, 16) -> 128 features.
    # Batch of 256 stacked environment observations -> 2 batch tiles of 128
    # (demonstrates the pipelined / megacore-parallel grid).
    batch, H, W = 256, 8, 16
    in_features = H * W
    hidden_size = 256          # scaled-down stand-in for the default 512
    output_shape = 128         # scaled-down stand-in for the default 256
                               # (kept a multiple of 128 for lane-dense stores)

    key = jax.random.PRNGKey(0)
    kx, kp = jax.random.split(key)
    x = jax.random.normal(kx, (batch, H, W), jnp.float32)
    w1, b1, w2, b2 = init_params(kp, in_features, hidden_size, output_shape)

    out = actor_critic_forward(x, w1, b1, w2, b2)
    out = jax.block_until_ready(out)
    assert out.shape == (batch, output_shape)

    # Pure-JAX f32 reference; loose tolerance covers the bf16 matmul inputs.
    x2d = x.reshape(-1, in_features)
    ref = jnp.maximum(jnp.maximum(x2d @ w1 + b1, 0.0) @ w2 + b2, 0.0)
    assert jnp.allclose(out.astype(jnp.float32), ref, atol=5e-2, rtol=5e-2), (
        float(jnp.max(jnp.abs(out.astype(jnp.float32) - ref))))

    print("KERNEL_OK")
</pallas_src>

<mosaic_0001>
module attributes {stable_mosaic.version = 11 : i64} {
  func.func @_mlp_kernel(%arg0: i32, %arg1: memref<128x128xbf16, #tpu.memory_space<vmem>>, %arg2: memref<128x256xbf16, #tpu.memory_space<vmem>>, %arg3: memref<1x256xf32, #tpu.memory_space<vmem>>, %arg4: memref<256x128xbf16, #tpu.memory_space<vmem>>, %arg5: memref<1x128xf32, #tpu.memory_space<vmem>>, %arg6: memref<128x128xf32, #tpu.memory_space<vmem>>) attributes {dimension_semantics = [#tpu.dimension_semantics<parallel>], iteration_bounds = array<i64: 2>, scalar_prefetch = 0 : i64, scratch_operands = 0 : i64, tpu.core_type = #tpu.core_type<tc>, window_params = [{transform_indices = @transform_0, window_bounds = array<i64: 128, 128>}, {pipeline_mode = #tpu.pipeline_mode<synchronous>, transform_indices = @transform_1, window_bounds = array<i64: 128, 256>}, {pipeline_mode = #tpu.pipeline_mode<synchronous>, transform_indices = @transform_2, window_bounds = array<i64: 1, 256>}, {pipeline_mode = #tpu.pipeline_mode<synchronous>, transform_indices = @transform_3, window_bounds = array<i64: 256, 128>}, {pipeline_mode = #tpu.pipeline_mode<synchronous>, transform_indices = @transform_4, window_bounds = array<i64: 1, 128>}, {transform_indices = @transform_5, window_bounds = array<i64: 128, 128>}]} {
    %c0 = arith.constant 0 : index
    %c0_0 = arith.constant 0 : index
    %0 = vector.load %arg1[%c0, %c0_0] : memref<128x128xbf16, #tpu.memory_space<vmem>>, vector<128x128xbf16>
    %c0_1 = arith.constant 0 : index
    %c0_2 = arith.constant 0 : index
    %1 = vector.load %arg2[%c0_1, %c0_2] : memref<128x256xbf16, #tpu.memory_space<vmem>>, vector<128x256xbf16>
    %cst = arith.constant dense<0.000000e+00> : vector<128x256xf32>
    %2 = tpu.matmul %0, %1, %cst {dimension_numbers = #tpu.dot_dimension_numbers<[1], [0], [0], [1], [0, 0, 1, 1], [], []>} : vector<128x128xbf16>, vector<128x256xbf16>, vector<128x256xf32> -> vector<128x256xf32>
    %c0_3 = arith.constant 0 : index
    %c0_4 = arith.constant 0 : index
    %3 = vector.load %arg3[%c0_3, %c0_4] : memref<1x256xf32, #tpu.memory_space<vmem>>, vector<1x256xf32>
    %4 = vector.broadcast %3 : vector<1x256xf32> to vector<128x256xf32>
    %5 = arith.addf %2, %4 : vector<128x256xf32>
    %cst_5 = arith.constant 0.000000e+00 : f32
    %6 = vector.broadcast %cst_5 : f32 to vector<128x256xf32>
    %7 = arith.maximumf %5, %6 : vector<128x256xf32>
    %8 = arith.truncf %7 : vector<128x256xf32> to vector<128x256xbf16>
    %c0_6 = arith.constant 0 : index
    %c0_7 = arith.constant 0 : index
    %9 = vector.load %arg4[%c0_6, %c0_7] : memref<256x128xbf16, #tpu.memory_space<vmem>>, vector<256x128xbf16>
    %cst_8 = arith.constant dense<0.000000e+00> : vector<128x128xf32>
    %10 = tpu.matmul %8, %9, %cst_8 {dimension_numbers = #tpu.dot_dimension_numbers<[1], [0], [0], [1], [0, 0, 1, 1], [], []>} : vector<128x256xbf16>, vector<256x128xbf16>, vector<128x128xf32> -> vector<128x128xf32>
    %c0_9 = arith.constant 0 : index
    %c0_10 = arith.constant 0 : index
    %11 = vector.load %arg5[%c0_9, %c0_10] : memref<1x128xf32, #tpu.memory_space<vmem>>, vector<1x128xf32>
    %12 = vector.broadcast %11 : vector<1x128xf32> to vector<128x128xf32>
    %13 = arith.addf %10, %12 : vector<128x128xf32>
    %cst_11 = arith.constant 0.000000e+00 : f32
    %14 = vector.broadcast %cst_11 : f32 to vector<128x128xf32>
    %15 = arith.maximumf %13, %14 : vector<128x128xf32>
    %c0_12 = arith.constant 0 : index
    %c0_13 = arith.constant 0 : index
    %16 = vector.load %arg6[%c0_12, %c0_13] : memref<128x128xf32, #tpu.memory_space<vmem>>, vector<128x128xf32>
    tpu.vector_store %arg6[%c0_12, %c0_13], %15 {strides = array<i32>} : memref<128x128xf32, #tpu.memory_space<vmem>>, vector<128x128xf32>,
    return
  }
  func.func @transform_0(%arg0: i32) -> (i32, i32) {
    %c0_i32 = arith.constant 0 : i32
    %c0_i32_0 = arith.constant 0 : i32
    return %arg0, %c0_i32 : i32, i32
  }
  func.func @transform_1(%arg0: i32) -> (i32, i32) {
    %c0_i32 = arith.constant 0 : i32
    %c0_i32_0 = arith.constant 0 : i32
    %c0_i32_1 = arith.constant 0 : i32
    return %c0_i32, %c0_i32_0 : i32, i32
  }
  func.func @transform_2(%arg0: i32) -> (i32, i32) {
    %c0_i32 = arith.constant 0 : i32
    %c0_i32_0 = arith.constant 0 : i32
    %c0_i32_1 = arith.constant 0 : i32
    return %c0_i32, %c0_i32_0 : i32, i32
  }
  func.func @transform_3(%arg0: i32) -> (i32, i32) {
    %c0_i32 = arith.constant 0 : i32
    %c0_i32_0 = arith.constant 0 : i32
    %c0_i32_1 = arith.constant 0 : i32
    return %c0_i32, %c0_i32_0 : i32, i32
  }
  func.func @transform_4(%arg0: i32) -> (i32, i32) {
    %c0_i32 = arith.constant 0 : i32
    %c0_i32_0 = arith.constant 0 : i32
    %c0_i32_1 = arith.constant 0 : i32
    return %c0_i32, %c0_i32_0 : i32, i32
  }
  func.func @transform_5(%arg0: i32) -> (i32, i32) {
    %c0_i32 = arith.constant 0 : i32
    %c0_i32_0 = arith.constant 0 : i32
    return %arg0, %c0_i32 : i32, i32
  }
}

</mosaic_0001>

<bundles_post_ra>
// kernel: actor_critic_forward.1
= control target key start
LH: loop header
LB: loop body
LE: loop exit
PB: predicated region body
PF: predicated region fallthrough
CT: control target
= control target key end

     0   :  { %10 = vsyncpa [#allocation3], 0  ;;  %s1505_s0 = inlined_call_operand.vmem [shape: bf16[256,128], index: 0, kind: input, shape index: {}]   ;;  %s1506_s1 = inlined_call_operand.vmem [shape: bf16[128,256], index: 1, kind: input, shape index: {}]   ;;  %s1507_s2 = inlined_call_operand.vmem [shape: f32[1,256], index: 2, kind: input, shape index: {}]   ;;  %s1508_s3 = inlined_call_operand.vmem [shape: bf16[256,128], index: 3, kind: input, shape index: {}]   ;;  %s1509_s4 = inlined_call_operand.vmem [shape: f32[1,128], index: 4, kind: input, shape index: {}]   ;;  %s1510_s5 = inlined_call_operand.hbm [shape: f32[256,128], index: 5, kind: output, shape index: {}]  }
   0x1   :  { %12 = vsyncpa [#allocation3 + $0x1], 0  ;;  %s1206_s18 = smov 0   ;;  %s1208_s19 = smov 0  }
   0x2   :  { %s1210_s20 = smov 0   ;;  %s1212_s21 = smov 0  }
   0x3 LB: > { %s1227_s22 = sadd.s32 4294967295, %s1170_s21   ;;  %s900_s23 = sadd.s32 4294967294, %s1170_s21   ;;  %s1170_s21 = sphi %s1212_s21, %s1516_s21   ;;  %s1166_s20 = sphi %s1210_s20, %s1515_s20   ;;  %s1162_s19 = sphi %s1208_s19, %s1514_s19   ;;  %s1158_s18 = sphi %s1206_s18, %s1513_s18  }
   0x4   : > { %s1231_s24 = sadd.s32 1, %s1170_s21   ;;  %s135_s25 = sadd.s32 1, %s1166_s20 }
   0x5   : > { %s132_s26 = ssub.s32 %s1170_s21, %s1231_s24  ;;  %p145_p0 = scmp.ne.s32.totalorder %s1166_s20, %s1162_s19 }
   0x6   : > { %p133_p1 = scmp.eq.s32.totalorder %s132_s26, 0  ;;  %p146_p2 = scmp.eq.s32.totalorder %s1227_s22, 1 }
   0x7   : > { %p151_p3 = scmp.ne.s32.totalorder %s1162_s19, %s1158_s18  ;;  %p152_p4 = scmp.eq.s32.totalorder %s900_s23, 1 }
   0x8   : > { %s1242_s27 = scalar_select %p133_p1, %s1166_s20, %s135_s25  }
   0x9   : > { %p1244_p5 = por %p146_p2, %p145_p0  ;;  %p1248_p6 = por %p152_p4, %p151_p3 }
   0xa   : > { %p903_p7 = scmp.ge.s32.totalorder %s1170_s21, 1  ;;  %p191_p8 = scmp.lt.s32.totalorder %s1170_s21, 3 }
   0xc   : > { %p192_p9 = pnand %p903_p7, %p191_p8 }
   0xd   : > { %v1060_v0 = vld [vmem:[%s1506_s1 + $0x4] ss:$8 sps:$4 sm:$0xff] (!%p192_p9)   ;;  %s905_s7 = sshll.u32 (!%p192_p9), %s1227_s22, 4  ;;  %v1062_v1 = vld [vmem:[%s1506_s1] ss:$8 sps:$4 sm:$0xff] (!%p192_p9)   ;;  %v1172_v2 = vmov (!%p192_p9), 0   ;;  %v261_v41 = vlaneseq (!%p192_p9) }
   0xe   : > { %195 = sbr.rel (%p192_p9) target bundleno = 560 (0x230), region = 40  ;;  %431 = vmatprep.mubr.bf16.mxu0 (!%p192_p9), %v1172_v2  ;;  %p220_p10 = scmp.lt.s32.totalorder (!%p192_p9), %s905_s7, 31  ;;  %399 = vmatprep.subr.bf16.mxu0 (!%p192_p9), %v1060_v0  ;;  %v1063_v3 = vld [vmem:[%s1506_s1 + $0x14] ss:$8 sps:$4 sm:$0xff] (!%p192_p9)   ;;  %v1065_v4 = vld [vmem:[%s1506_s1 + $0x10] ss:$8 sps:$4 sm:$0xff] (!%p192_p9)  }
   0xf   : > { %400 = vmatpush1.bf16.msra.mxu0 (!%p192_p9), %v1062_v1  ;;  %v1066_v5 = vld [vmem:[%s1506_s1 + $0x24] ss:$8 sps:$4 sm:$0xff] (!%p192_p9)   ;;  %v1068_v6 = vld [vmem:[%s1506_s1 + $0x20] ss:$8 sps:$4 sm:$0xff] (!%p192_p9)   ;;  %v1069_v7 = vld [vmem:[%s1506_s1 + $0x34] ss:$8 sps:$4 sm:$0xff] (!%p192_p9)  }
  0x10   : > { %401 = vmatprep.subr.bf16.mxu0 (!%p192_p9), %v1063_v3  ;;  %v1071_v8 = vld [vmem:[%s1506_s1 + $0x30] ss:$8 sps:$4 sm:$0xff] (!%p192_p9)   ;;  %v1072_v9 = vld [vmem:[%s1506_s1 + $0x44] ss:$8 sps:$4 sm:$0xff] (!%p192_p9)   ;;  %v1074_v10 = vld [vmem:[%s1506_s1 + $0x40] ss:$8 sps:$4 sm:$0xff] (!%p192_p9)  }
  0x11   : > { %v1075_v11 = vld [vmem:[%s1506_s1 + $0x54] ss:$8 sps:$4 sm:$0xff] (!%p192_p9)   ;;  %v1077_v12 = vld [vmem:[%s1506_s1 + $0x50] ss:$8 sps:$4 sm:$0xff] (!%p192_p9)   ;;  %v1078_v13 = vld [vmem:[%s1506_s1 + $0x64] ss:$8 sps:$4 sm:$0xff] (!%p192_p9)  }
  0x12   : > { %v1092_v14 = vld [vmem:[%s1508_s3 + $0x40] sm:$0xff] (!%p192_p9)   ;;  %v1094_v17 = vld [vmem:[%s1508_s3 + $0x48] sm:$0xff] (!%p192_p9)   ;;  %v1096_v19 = vld [vmem:[%s1508_s3 + $0x50] sm:$0xff] (!%p192_p9)   ;;  %v262_v42 = vshrl.u32 (!%p192_p9), %v261_v41, 7  ;;  %s216_s14 = sand.u32 (!%p192_p9), 1, %s1162_s19   ;;  %s953_s25 = sshll.u32 (!%p192_p9), %s1227_s22, 11 }
  0x13   : > { %402 = vmatpush1.bf16.msra.mxu0 (!%p192_p9), %v1065_v4  ;;  %v1093_v15 = vld [vmem:[%s1508_s3] sm:$0xff] (!%p192_p9)   ;;  %954 = vmatprep.subr.bf16.mxu1 (!%p192_p9), %v1092_v14  ;;  %v1095_v18 = vld [vmem:[%s1508_s3 + $0x8] sm:$0xff] (!%p192_p9)   ;;  %v1081_v20 = vld [vmem:[%s1506_s1 + $0x74] ss:$8 sps:$4 sm:$0xff] (!%p192_p9)   ;;  %s904_s17 = sshll.u32 (!%p192_p9), %s216_s14, 7  ;;  %s1456_s9 = scalar_lea.hbm (!%p192_p9), %s1510_s5, %s953_s25 }
  0x14   : > { %403 = vmatprep.subr.bf16.mxu0 (!%p192_p9), %v1066_v5  ;;  %v1080_v16 = vld [vmem:[%s1506_s1 + $0x60] ss:$8 sps:$4 sm:$0xff] (!%p192_p9)   ;;  %955 = vmatpush3.bf16.msra.mxu1 (!%p192_p9), %v1093_v15  ;;  %v1083_v21 = vld [vmem:[%s1506_s1 + $0x70] ss:$8 sps:$4 sm:$0xff] (!%p192_p9)   ;;  %v263_v43 = vsub.s32 (!%p192_p9), 0, %v262_v42  ;;  %v267_v45 = vsub.s32 (!%p192_p9), 1, %v262_v42 }
  0x15   : > { %s1518_s7 = smov (!%p220_p10, %s905_s7), 31  ;;  %956 = vmatprep.subr.bf16.mxu1 %v1094_v17  ;;  %v1097_v22 = vld [vmem:[%s1508_s3 + $0x10] sm:$0xff]   ;;  %v1098_v23 = vld [vmem:[%s1508_s3 + $0x58] sm:$0xff]   ;;  %v1100_v26 = vld [vmem:[%s1508_s3 + $0x60] sm:$0xff]   ;;  %s1421_s23 = scalar_lea.vmem [#allocation2], %s904_s17 }
  0x16   : > { %s906_s16 = sshll.u32 %s1518_s7, 2  ;;  %v1099_v25 = vld [vmem:[%s1508_s3 + $0x18] sm:$0xff]   ;;  %v1101_v27 = vld [vmem:[%s1508_s3 + $0x20] sm:$0xff]   ;;  %v1102_v28 = vld [vmem:[%s1508_s3 + $0x68] sm:$0xff]   ;;  %s838_s26 = sshll.u32 %s1421_s23, 4  ;;  %s1458_s26 = int_to_ptr.vmem [resolvable:$true] %s838_s26 }
  0x17   : > { %s1280_s8 = scalar_lea.vmem %s1505_s0, %s906_s16  ;;  %404 = vmatpush1.bf16.msra.mxu0 %v1068_v6  ;;  %v1103_v36 = vld [vmem:[%s1508_s3 + $0x28] sm:$0xff]   ;;  %v1104_v37 = vld [vmem:[%s1508_s3 + $0x70] sm:$0xff]   ;;  %v1106_v39 = vld [vmem:[%s1508_s3 + $0x78] sm:$0xff]   ;;  %s1464_s10 = scalar_lea.sflag [#allocation3], %s216_s14 }
  0x18   : > { %405 = vmatprep.subr.bf16.mxu0 %v1069_v7  ;;  %957 = vmatpush3.bf16.msra.mxu1 %v1095_v18  ;;  %v1084_v24 = vld [vmem:[%s1280_s8] sm:$0xff]   ;;  %v1085_v29 = vld [vmem:[%s1280_s8 + $0x8] sm:$0xff]   ;;  %v1086_v30 = vld [vmem:[%s1280_s8 + $0x10] sm:$0xff]   ;;  %s1108_s22 = scalar_lea.vmem %s1458_s26, 2048  ;;  %s1173_s7 = smov [#allocation2]  }
  0x19   : > { %958 = vmatprep.subr.bf16.mxu1 %v1096_v19  ;;  %v1087_v31 = vld [vmem:[%s1280_s8 + $0x18] sm:$0xff]   ;;  %v1088_v32 = vld [vmem:[%s1280_s8 + $0x20] sm:$0xff]   ;;  %v1089_v33 = vld [vmem:[%s1280_s8 + $0x28] sm:$0xff]   ;;  %p1109_p11 = scmp.ne.s32.totalorder %s1458_s26, %s1108_s22 }
  0x1a   : > { %v1090_v34 = vld [vmem:[%s1280_s8 + $0x30] sm:$0xff]   ;;  %v1091_v35 = vld [vmem:[%s1280_s8 + $0x38] sm:$0xff]   ;;  %v259_v44 = vld [vmem:[%s1507_s2] sm:$0x3]  ;;  %s1112_s8 = sshll.u32 %s1173_s7, 4  ;;  %s1113_s8 = int_to_ptr.vmem [resolvable:$false] %s1112_s8 }
  0x1b   : > { %406 = vmatpush1.bf16.msra.mxu0 %v1071_v8  ;;  %v1105_v38 = vld [vmem:[%s1508_s3 + $0x30] sm:$0xff]   ;;  %v1107_v40 = vld [vmem:[%s1508_s3 + $0x38] sm:$0xff]   ;;  %v1375_v46 = vrot.slane %v259_v44, %v263_v43  ;;  %v1377_v47 = vrot.slane %v259_v44, %v267_v45  ;;  %p1110_p12 = pnand %p1109_p11, %p1244_p5  ;;  %s1114_s11 = scalar_lea.vmem %s1113_s8, 4096 }
  0x1c   : > { %407 = vmatprep.subr.bf16.mxu0 %v1072_v9  ;;  %959 = vmatpush3.bf16.msra.mxu1 %v1097_v22  ;;  %p1115_p0 = scmp.lt.s32.totalorder %s1458_s26, %s1113_s8  ;;  %p1116_p1 = scmp.lt.s32.totalorder %s1114_s11, %s1108_s22 }
  0x1d   : > { %960 = vmatprep.subr.bf16.mxu1 %v1098_v23  ;;  %p1111_p13 = pneg %p1110_p12 }
  0x1e   : > { %p1117_p2 = por %p1116_p1, %p1115_p0 }
  0x1f   : > { %408 = vmatpush1.bf16.msra.mxu0 %v1074_v10 }
  0x20   : > { %409 = vmatprep.subr.bf16.mxu0 %v1075_v11  ;;  %961 = vmatpush3.bf16.msra.mxu1 %v1099_v25  ;;  %p1118_p3 = pnand %p1117_p2, %p1111_p13 }
  0x21   : > { %962 = vmatprep.subr.bf16.mxu1 %v1100_v26 }
  0x23   : > { %410 = vmatpush1.bf16.msra.mxu0 %v1077_v12 }
  0x24   : > { %411 = vmatprep.subr.bf16.mxu0 %v1078_v13  ;;  %963 = vmatpush3.bf16.msra.mxu1 %v1101_v27 }
  0x25   : > { %964 = vmatprep.subr.bf16.mxu1 %v1102_v28 }
  0x27   : > { %412 = vmatpush1.bf16.msra.mxu0 %v1080_v16 }
  0x28   : > { %413 = vmatprep.subr.bf16.mxu0 %v1081_v20  ;;  %965 = vmatpush3.bf16.msra.mxu1 %v1103_v36 }
  0x29   : > { %966 = vmatprep.subr.bf16.mxu1 %v1104_v37 }
  0x2b   : > { %414 = vmatpush1.bf16.msra.mxu0 %v1083_v21 }
  0x2c   : > { %967 = vmatpush3.bf16.msra.mxu1 %v1105_v38 }
  0x2d   : > { %968 = vmatprep.subr.bf16.mxu1 %v1106_v39 }
  0x2e   : > { %432 = vmatmul.mubr.bf16.vlgmr.msra.gmra.mrb[0].mxu0 %v1084_v24 }
  0x2f   : > { %441 = vmatprep.mubr.bf16.mxu0 %v1172_v2 }
  0x30   : > { %969 = vmatpush3.bf16.msra.mxu1 %v1107_v40 }
  0x36   : > { %442 = vmatmul.mubr.bf16.gmra.mrb[4].mxu0 %v1085_v29 }
  0x37   : > { %451 = vmatprep.mubr.bf16.mxu0 %v1172_v2 }
  0x3e   : > { %452 = vmatmul.mubr.bf16.gmra.mrb[8].mxu0 %v1086_v30 }
  0x3f   : > { %461 = vmatprep.mubr.bf16.mxu0 %v1172_v2 }
  0x46   : > { %462 = vmatmul.mubr.bf16.gmra.mrb[12].mxu0 %v1087_v31 }
  0x47   : > { %471 = vmatprep.mubr.bf16.mxu0 %v1172_v2 }
  0x4e   : > { %472 = vmatmul.mubr.bf16.gmra.mrb[16].mxu0 %v1088_v32 }
  0x4f   : > { %481 = vmatprep.mubr.bf16.mxu0 %v1172_v2 }
  0x56   : > { %482 = vmatmul.mubr.bf16.gmra.mrb[20].mxu0 %v1089_v33 }
  0x57   : > { %491 = vmatprep.mubr.bf16.mxu0 %v1172_v2 }
  0x5e   : > { %492 = vmatmul.mubr.bf16.gmra.mrb[24].mxu0 %v1090_v34 }
  0x5f   : > { %501 = vmatprep.mubr.bf16.mxu0 %v1172_v2 }
  0x66   : > { %502 = vmatmul.mubr.bf16.gmra.mrb[28].mxu0 %v1091_v35 }
 0x101   : > { %v433_v48 = vpop.f32.mrb[0].mxu0 }
 0x102   : > { %v434_v49 = vadd.f32 %v433_v48, %v1375_v46  ;;  %v435_v50 = vpop.f32.mrb[1].mxu0 }
 0x103   : > { %v436_v51 = vadd.f32 %v435_v50, %v1377_v47  ;;  %v437_v52 = vpop.f32.mrb[2].mxu0 }
 0x104   : > { %v438_v53 = vadd.f32 %v437_v52, %v1375_v46  ;;  %v439_v54 = vpop.f32.mrb[3].mxu0  ;;  %v512_v56 = vmax.f32 %v434_v49, 0.0 }
 0x105   : > { %v440_v55 = vadd.f32 %v439_v54, %v1377_v47  ;;  %v513_v58 = vmax.f32 %v436_v51, 0.0 }
 0x106   : > { %v514_v57 = vmax.f32 %v438_v53, 0.0 }
 0x107   : > { %v515_v59 = vmax.f32 %v440_v55, 0.0 }
 0x108   : > { %v544_v60 = vpack.c.bf16 %v514_v57, %v512_v56 }
 0x109   : > { %v443_v61 = vpop.f32.mrb[4].mxu0  ;;  %v545_v62 = vpack.c.bf16 %v515_v59, %v513_v58 }
 0x10a   : > { %v444_v63 = vadd.f32 %v443_v61, %v1375_v46  ;;  %v445_v0 = vpop.f32.mrb[5].mxu0 }
 0x10b   : > { %v446_v1 = vadd.f32 %v445_v0, %v1377_v47  ;;  %v447_v2 = vpop.f32.mrb[6].mxu0  ;;  %727 = vmatprep.mubr.bf16.mxu1 %v545_v62 }
 0x10c   : > { %v448_v3 = vadd.f32 %v447_v2, %v1375_v46  ;;  %v449_v4 = vpop.f32.mrb[7].mxu0  ;;  %728 = vmatmul.mubr.bf16.vlgmr.msra.gmra.mrb[0].mxu1 %v544_v60  ;;  %v516_v6 = vmax.f32 %v444_v63, 0.0 }
 0x10d   : > { %v450_v5 = vadd.f32 %v449_v4, %v1377_v47  ;;  %v517_v8 = vmax.f32 %v446_v1, 0.0 }
 0x10e   : > { %v518_v7 = vmax.f32 %v448_v3, 0.0 }
 0x10f   : > { %v519_v9 = vmax.f32 %v450_v5, 0.0 }
 0x110   : > { %v546_v10 = vpack.c.bf16 %v518_v7, %v516_v6 }
 0x111   : > { %v547_v11 = vpack.c.bf16 %v519_v9, %v517_v8  ;;  %v453_v12 = vpop.f32.mrb[8].mxu0 }
 0x112   : > { %v454_v13 = vadd.f32 %v453_v12, %v1375_v46  ;;  %v455_v14 = vpop.f32.mrb[9].mxu0 }
 0x113   : > { %v456_v15 = vadd.f32 %v455_v14, %v1377_v47  ;;  %v457_v16 = vpop.f32.mrb[10].mxu0  ;;  %735 = vmatprep.mubr.bf16.mxu1 %v547_v11 }
 0x114   : > { %v458_v17 = vadd.f32 %v457_v16, %v1375_v46  ;;  %v459_v18 = vpop.f32.mrb[11].mxu0  ;;  %736 = vmatmul.mubr.bf16.gmra.mrb[4].mxu1 %v546_v10  ;;  %v520_v20 = vmax.f32 %v454_v13, 0.0 }
 0x115   : > { %v460_v19 = vadd.f32 %v459_v18, %v1377_v47  ;;  %v521_v22 = vmax.f32 %v456_v15, 0.0 }
 0x116   : > { %v522_v21 = vmax.f32 %v458_v17, 0.0 }
 0x117   : > { %v523_v23 = vmax.f32 %v460_v19, 0.0 }
 0x118   : > { %v548_v24 = vpack.c.bf16 %v522_v21, %v520_v20 }
 0x119   : > { %v549_v25 = vpack.c.bf16 %v523_v23, %v521_v22  ;;  %v463_v26 = vpop.f32.mrb[12].mxu0 }
 0x11a   : > { %v464_v27 = vadd.f32 %v463_v26, %v1375_v46  ;;  %v465_v28 = vpop.f32.mrb[13].mxu0 }
 0x11b   : > { %v466_v29 = vadd.f32 %v465_v28, %v1377_v47  ;;  %v467_v30 = vpop.f32.mrb[14].mxu0  ;;  %743 = vmatprep.mubr.bf16.mxu1 %v549_v25 }
 0x11c   : > { %v468_v31 = vadd.f32 %v467_v30, %v1375_v46  ;;  %v469_v32 = vpop.f32.mrb[15].mxu0  ;;  %744 = vmatmul.mubr.bf16.gmra.mrb[8].mxu1 %v548_v24  ;;  %v524_v34 = vmax.f32 %v464_v27, 0.0 }
 0x11d   : > { %v470_v33 = vadd.f32 %v469_v32, %v1377_v47  ;;  %v525_v36 = vmax.f32 %v466_v29, 0.0 }
 0x11e   : > { %v526_v35 = vmax.f32 %v468_v31, 0.0 }
 0x11f   : > { %v527_v37 = vmax.f32 %v470_v33, 0.0 }
 0x120   : > { %v550_v38 = vpack.c.bf16 %v526_v35, %v524_v34  ;;  %v1415_v35 = vld [vmem:[%s1509_s4] ss:$0 sm:$0xff] }
 0x121   : > { %v551_v39 = vpack.c.bf16 %v527_v37, %v525_v36  ;;  %v473_v40 = vpop.f32.mrb[16].mxu0 }
 0x122   : > { %v474_v41 = vadd.f32 %v473_v40, %v1375_v46  ;;  %v475_v42 = vpop.f32.mrb[17].mxu0 }
 0x123   : > { %v476_v43 = vadd.f32 %v475_v42, %v1377_v47  ;;  %v477_v44 = vpop.f32.mrb[18].mxu0  ;;  %751 = vmatprep.mubr.bf16.mxu1 %v551_v39 }
 0x124   : > { %v478_v45 = vadd.f32 %v477_v44, %v1375_v46  ;;  %v479_v48 = vpop.f32.mrb[19].mxu0  ;;  %752 = vmatmul.mubr.bf16.gmra.mrb[12].mxu1 %v550_v38  ;;  %v528_v50 = vmax.f32 %v474_v41, 0.0 }
 0x125   : > { %v480_v49 = vadd.f32 %v479_v48, %v1377_v47  ;;  %v529_v52 = vmax.f32 %v476_v43, 0.0 }
 0x126   : > { %v530_v51 = vmax.f32 %v478_v45, 0.0 }
 0x127   : > { %v531_v53 = vmax.f32 %v480_v49, 0.0 }
 0x128   : > { %v552_v54 = vpack.c.bf16 %v530_v51, %v528_v50 }
 0x129   : > { %v553_v55 = vpack.c.bf16 %v531_v53, %v529_v52  ;;  %v483_v56 = vpop.f32.mrb[20].mxu0 }
 0x12a   : > { %v484_v57 = vadd.f32 %v483_v56, %v1375_v46  ;;  %v485_v58 = vpop.f32.mrb[21].mxu0 }
 0x12b   : > { %v486_v59 = vadd.f32 %v485_v58, %v1377_v47  ;;  %v487_v60 = vpop.f32.mrb[22].mxu0  ;;  %759 = vmatprep.mubr.bf16.mxu1 %v553_v55 }
 0x12c   : > { %v488_v61 = vadd.f32 %v487_v60, %v1375_v46  ;;  %v489_v62 = vpop.f32.mrb[23].mxu0  ;;  %760 = vmatmul.mubr.bf16.gmra.mrb[16].mxu1 %v552_v54  ;;  %v532_v0 = vmax.f32 %v484_v57, 0.0 }
 0x12d   : > { %v490_v63 = vadd.f32 %v489_v62, %v1377_v47  ;;  %v533_v2 = vmax.f32 %v486_v59, 0.0 }
 0x12e   : > { %v534_v1 = vmax.f32 %v488_v61, 0.0 }
 0x12f   : > { %v535_v3 = vmax.f32 %v490_v63, 0.0 }
 0x130   : > { %v554_v4 = vpack.c.bf16 %v534_v1, %v532_v0 }
 0x131   : > { %v555_v5 = vpack.c.bf16 %v535_v3, %v533_v2  ;;  %v493_v6 = vpop.f32.mrb[24].mxu0 }
 0x132   : > { %v494_v7 = vadd.f32 %v493_v6, %v1375_v46  ;;  %v495_v8 = vpop.f32.mrb[25].mxu0 }
 0x133   : > { %v496_v9 = vadd.f32 %v495_v8, %v1377_v47  ;;  %v497_v10 = vpop.f32.mrb[26].mxu0  ;;  %767 = vmatprep.mubr.bf16.mxu1 %v555_v5 }
 0x134   : > { %v498_v11 = vadd.f32 %v497_v10, %v1375_v46  ;;  %v499_v12 = vpop.f32.mrb[27].mxu0  ;;  %768 = vmatmul.mubr.bf16.gmra.mrb[20].mxu1 %v554_v4  ;;  %v536_v14 = vmax.f32 %v494_v7, 0.0 }
 0x135   : > { %v500_v13 = vadd.f32 %v499_v12, %v1377_v47  ;;  %v537_v16 = vmax.f32 %v496_v9, 0.0 }
 0x136   : > { %v538_v15 = vmax.f32 %v498_v11, 0.0 }
 0x137   : > { %v539_v17 = vmax.f32 %v500_v13, 0.0 }
 0x138   : > { %v556_v18 = vpack.c.bf16 %v538_v15, %v536_v14 }
 0x139   : > { %v557_v19 = vpack.c.bf16 %v539_v17, %v537_v16  ;;  %v503_v20 = vpop.f32.mrb[28].mxu0 }
 0x13a   : > { %v504_v21 = vadd.f32 %v503_v20, %v1375_v46  ;;  %v505_v22 = vpop.f32.mrb[29].mxu0 }
 0x13b   : > { %v506_v23 = vadd.f32 %v505_v22, %v1377_v47  ;;  %v507_v24 = vpop.f32.mrb[30].mxu0  ;;  %775 = vmatprep.mubr.bf16.mxu1 %v557_v19 }
 0x13c   : > { %v508_v25 = vadd.f32 %v507_v24, %v1375_v46  ;;  %v509_v26 = vpop.f32.mrb[31].mxu0  ;;  %776 = vmatmul.mubr.bf16.gmra.mrb[24].mxu1 %v556_v18  ;;  %v540_v28 = vmax.f32 %v504_v21, 0.0 }
 0x13d   : > { %v510_v27 = vadd.f32 %v509_v26, %v1377_v47  ;;  %v541_v30 = vmax.f32 %v506_v23, 0.0 }
 0x13e   : > { %v542_v29 = vmax.f32 %v508_v25, 0.0 }
 0x13f   : > { %v543_v31 = vmax.f32 %v510_v27, 0.0 }
 0x140   : > { %v558_v32 = vpack.c.bf16 %v542_v29, %v540_v28 }
 0x141   : > { %v559_v33 = vpack.c.bf16 %v543_v31, %v541_v30 }
 0x143   : > { %783 = vmatprep.mubr.bf16.mxu1 %v559_v33 }
 0x144   : > { %784 = vmatmul.mubr.bf16.gmra.mrb[28].mxu1 %v558_v32 }
 0x1df   : > { %v970_v34 = vpop.f32.mrb[0].mxu1 }
 0x1e0   : > { %v971_v46 = vpop.f32.mrb[1].mxu1 }
 0x1e1   : > { %v972_v36 = vadd.f32 %v971_v46, %v970_v34  ;;  %v973_v47 = vpop.f32.mrb[2].mxu1 }
 0x1e2   : > { %v974_v37 = vpop.f32.mrb[3].mxu1 }
 0x1e3   : > { %v730_v38 = vadd.f32 %v972_v36, %v1415_v35  ;;  %v975_v39 = vadd.f32 %v974_v37, %v973_v47 }
 0x1e5   : > { %v792_v40 = vmax.f32 %v730_v38, 0.0  ;;  %v733_v41 = vadd.f32 %v975_v39, %v1415_v35 }
 0x1e7   : > { %808 = vst [vmem:[%s1421_s23] sm:$0xff] %v792_v40  ;;  %v793_v42 = vmax.f32 %v733_v41, 0.0  ;;  %v976_v43 = vpop.f32.mrb[4].mxu1 }
 0x1e8   : > { %v977_v44 = vpop.f32.mrb[5].mxu1 }
 0x1e9   : > { %809 = vst [vmem:[%s1421_s23 + $0x8] sm:$0xff] %v793_v42  ;;  %v978_v45 = vadd.f32 %v977_v44, %v976_v43  ;;  %v979_v48 = vpop.f32.mrb[6].mxu1 }
 0x1ea   : > { %v980_v49 = vpop.f32.mrb[7].mxu1 }
 0x1eb   : > { %v738_v50 = vadd.f32 %v978_v45, %v1415_v35  ;;  %v981_v51 = vadd.f32 %v980_v49, %v979_v48 }
 0x1ed   : > { %v794_v52 = vmax.f32 %v738_v50, 0.0  ;;  %v741_v53 = vadd.f32 %v981_v51, %v1415_v35 }
 0x1ef   : > { %810 = vst [vmem:[%s1421_s23 + $0x10] sm:$0xff] %v794_v52  ;;  %v795_v54 = vmax.f32 %v741_v53, 0.0  ;;  %v982_v55 = vpop.f32.mrb[8].mxu1 }
 0x1f0   : > { %v983_v56 = vpop.f32.mrb[9].mxu1 }
 0x1f1   : > { %811 = vst [vmem:[%s1421_s23 + $0x18] sm:$0xff] %v795_v54  ;;  %v984_v57 = vadd.f32 %v983_v56, %v982_v55  ;;  %v985_v58 = vpop.f32.mrb[10].mxu1 }
 0x1f2   : > { %v986_v59 = vpop.f32.mrb[11].mxu1 }
 0x1f3   : > { %v746_v60 = vadd.f32 %v984_v57, %v1415_v35  ;;  %v987_v61 = vadd.f32 %v986_v59, %v985_v58 }
 0x1f5   : > { %v796_v62 = vmax.f32 %v746_v60, 0.0  ;;  %v749_v63 = vadd.f32 %v987_v61, %v1415_v35 }
 0x1f7   : > { %812 = vst [vmem:[%s1421_s23 + $0x20] sm:$0xff] %v796_v62  ;;  %v797_v0 = vmax.f32 %v749_v63, 0.0  ;;  %v988_v1 = vpop.f32.mrb[12].mxu1 }
 0x1f8   : > { %v989_v2 = vpop.f32.mrb[13].mxu1 }
 0x1f9   : > { %813 = vst [vmem:[%s1421_s23 + $0x28] sm:$0xff] %v797_v0  ;;  %v990_v3 = vadd.f32 %v989_v2, %v988_v1  ;;  %v991_v4 = vpop.f32.mrb[14].mxu1 }
 0x1fa   : > { %v992_v5 = vpop.f32.mrb[15].mxu1 }
 0x1fb   : > { %v754_v6 = vadd.f32 %v990_v3, %v1415_v35  ;;  %v993_v7 = vadd.f32 %v992_v5, %v991_v4 }
 0x1fd   : > { %v798_v8 = vmax.f32 %v754_v6, 0.0  ;;  %v757_v9 = vadd.f32 %v993_v7, %v1415_v35 }
 0x1ff   : > { %814 = vst [vmem:[%s1421_s23 + $0x30] sm:$0xff] %v798_v8  ;;  %v799_v10 = vmax.f32 %v757_v9, 0.0  ;;  %v994_v11 = vpop.f32.mrb[16].mxu1 }
 0x200   : > { %v995_v12 = vpop.f32.mrb[17].mxu1 }
 0x201   : > { %815 = vst [vmem:[%s1421_s23 + $0x38] sm:$0xff] %v799_v10  ;;  %v996_v13 = vadd.f32 %v995_v12, %v994_v11  ;;  %v997_v14 = vpop.f32.mrb[18].mxu1 }
 0x202   : > { %v998_v15 = vpop.f32.mrb[19].mxu1 }
 0x203   : > { %v762_v16 = vadd.f32 %v996_v13, %v1415_v35  ;;  %v999_v17 = vadd.f32 %v998_v15, %v997_v14 }
 0x205   : > { %v800_v18 = vmax.f32 %v762_v16, 0.0  ;;  %v765_v19 = vadd.f32 %v999_v17, %v1415_v35 }
 0x207   : > { %816 = vst [vmem:[%s1421_s23 + $0x40] sm:$0xff] %v800_v18  ;;  %v801_v20 = vmax.f32 %v765_v19, 0.0  ;;  %v1000_v21 = vpop.f32.mrb[20].mxu1 }
 0x208   : > { %v1001_v22 = vpop.f32.mrb[21].mxu1 }
 0x209   : > { %817 = vst [vmem:[%s1421_s23 + $0x48] sm:$0xff] %v801_v20  ;;  %v1002_v23 = vadd.f32 %v1001_v22, %v1000_v21  ;;  %v1003_v24 = vpop.f32.mrb[22].mxu1 }
 0x20a   : > { %v1004_v25 = vpop.f32.mrb[23].mxu1 }
 0x20b   : > { %v770_v26 = vadd.f32 %v1002_v23, %v1415_v35  ;;  %v1005_v27 = vadd.f32 %v1004_v25, %v1003_v24 }
 0x20d   : > { %v802_v28 = vmax.f32 %v770_v26, 0.0  ;;  %v773_v29 = vadd.f32 %v1005_v27, %v1415_v35 }
 0x20f   : > { %818 = vst [vmem:[%s1421_s23 + $0x50] sm:$0xff] %v802_v28  ;;  %v803_v30 = vmax.f32 %v773_v29, 0.0  ;;  %v1006_v31 = vpop.f32.mrb[24].mxu1 }
 0x210   : > { %v1007_v32 = vpop.f32.mrb[25].mxu1 }
 0x211   : > { %819 = vst [vmem:[%s1421_s23 + $0x58] sm:$0xff] %v803_v30  ;;  %v1008_v33 = vadd.f32 %v1007_v32, %v1006_v31  ;;  %v1009_v34 = vpop.f32.mrb[26].mxu1 }
 0x212   : > { %v1010_v46 = vpop.f32.mrb[27].mxu1 }
 0x213   : > { %v778_v36 = vadd.f32 %v1008_v33, %v1415_v35  ;;  %v1011_v47 = vadd.f32 %v1010_v46, %v1009_v34 }
 0x215   : > { %v804_v37 = vmax.f32 %v778_v36, 0.0  ;;  %v781_v38 = vadd.f32 %v1011_v47, %v1415_v35 }
 0x217   : > { %820 = vst [vmem:[%s1421_s23 + $0x60] sm:$0xff] %v804_v37  ;;  %v805_v39 = vmax.f32 %v781_v38, 0.0  ;;  %v1012_v40 = vpop.f32.mrb[28].mxu1 }
 0x218   : > { %v1013_v41 = vpop.f32.mrb[29].mxu1 }
 0x219   : > { %821 = vst [vmem:[%s1421_s23 + $0x68] sm:$0xff] %v805_v39  ;;  %v1014_v42 = vadd.f32 %v1013_v41, %v1012_v40  ;;  %v1015_v43 = vpop.f32.mrb[30].mxu1 }
 0x21a   : > { %v1016_v44 = vpop.f32.mrb[31].mxu1 }
 0x21b   : > { %v786_v45 = vadd.f32 %v1014_v42, %v1415_v35  ;;  %v1017_v48 = vadd.f32 %v1016_v44, %v1015_v43 }
 0x21d   : > { %v806_v49 = vmax.f32 %v786_v45, 0.0  ;;  %v789_v50 = vadd.f32 %v1017_v48, %v1415_v35 }
 0x21f   : > { %822 = vst [vmem:[%s1421_s23 + $0x70] sm:$0xff] %v806_v49  ;;  %v807_v51 = vmax.f32 %v789_v50, 0.0 }
 0x221   : > { %823 = vst [vmem:[%s1421_s23 + $0x78] sm:$0xff] %v807_v51 }
 0x222   : > { %1121 = shalt.err (!%p1118_p3)
}
 0x223   : > { %s1122_s12 = scalar_lea.hbm %s1456_s9, 2048  ;;  %s1126_s15 = scalar_lea.hbm %s1510_s5, 4096 }
 0x224   : > { %p1123_p4 = scmp.ne.s32.totalorder %s1456_s9, %s1122_s12  ;;  %p1127_p9 = scmp.lt.u32.totalorder %s1456_s9, %s1510_s5 }
 0x225   : > { %p1128_p10 = scmp.lt.u32.totalorder %s1126_s15, %s1122_s12  ;;  %p1130_p12 = scmp.lt.u32.totalorder %s1122_s12, %s1456_s9 }
 0x226   : > { %p1124_p7 = pnand %p1123_p4, %p1244_p5 }
 0x227   : > { %p1129_p11 = por %p1128_p10, %p1127_p9 }
 0x228   : > { %p1125_p8 = pneg %p1124_p7 }
 0x229   : > { %p1131_p13 = por %p1130_p12, %p1129_p11 }
 0x22b   : > { %p1132_p0 = pnand %p1131_p13, %p1125_p8 }
 0x22d   : > { %1135 = shalt.err (!%p1132_p0)
}
 0x22e   : > { %s1174_s23 = smov 128   ;;  %s1175_s25 = smov 8  }
 0x22f   : > { %1018 = dma.vmem_to_hbm [thread:$0]  (%p1244_p5), %s1458_s26, 2048, %s1456_s9, %s1464_s10, %s1174_s23, %s1174_s23, %s1175_s25  }
 0x230 PF: > { %p1024_p1 = scmp.ge.s32.totalorder %s1170_s21, 2  ;;  %s853_s30 = sand.u32 1, %s1158_s18  }
 0x231   : > { %s854_s6 = scalar_lea.sflag [#allocation3], %s853_s30 }
 0x232   : > { %p1021_p2 = pnand %p1024_p1, %p1248_p6 }
 0x234   : > { %1153 = dma.done.wait (!%p1021_p2), %s854_s6, 2048  }
 0x235   : > { %1155 = vsyncadd (!%p1021_p2), %s854_s6, 4294965248  ;;  %p15_p3 = scmp.ge.s32.totalorder %s1231_s24, 4   ;;  %s1513_s18 = smov %s1162_s19 }
 0x236   : > { %s1514_s19 = smov %s1166_s20  ;;  %s1515_s20 = smov %s1242_s27 }
 0x237   : > { %s1516_s21 = smov %s1231_s24  ;;  %17 = sbr.rel (!%p15_p3) target bundleno = 3 (0x3), region = 75 }
 0x23e   :  { %859 = vsyncpa [#allocation3], 1 }
 0x23f   :  { %861 = vsyncpa [#allocation3 + $0x1], 1 }

</bundles_post_ra>
